<compile_context>
chip_gen: v7x
topology: tpu7x:2x2x1
jax: 0.10.0
libtpu: 0.0.40
codegen_flags: <defaults>
</compile_context>

<pallas_src>
import jax
import jax.numpy as jnp
from jax.experimental import pallas as pl
from jax.experimental.pallas import tpu as pltpu


def linear_kernel(wb_ref, x_ref, o_ref):
    # wb_ref: (D+1,) f32 in SMEM  -- packed [w_0, ..., w_{D-1}, bias]
    # x_ref : (TB, D) f32 in VMEM -- natural layout, batch on the sublane axis
    # o_ref : (TB, 1) f32 in VMEM
    D = x_ref.shape[1]
    # VPU multiply-add, fully unrolled (D is tiny and static):
    acc = x_ref[:, 0:1] * wb_ref[0]
    for d in range(1, D):
        acc = acc + x_ref[:, d:d + 1] * wb_ref[d]
    acc = acc + wb_ref[D]  # bias
    o_ref[...] = acc.astype(o_ref.dtype)


def linear_forward(x, wb, *, tile_b=512):
    """y = x @ w[:, None] + b, matching nn.Linear(input_dims, 1).

    x : (B, D) f32
    wb: (D+1,) f32 packed [w..., b]  (pack once at parameter-init time)
    returns (B, 1) f32.
    """
    B, D = x.shape
    assert wb.shape == (D + 1,)

    if B >= tile_b and B % tile_b == 0:
        # Large-batch path: tile the batch axis and run it "parallel" so both
        # TensorCores on a v7x chip each take half the tiles; each (tile_b, D)
        # block double-buffers its DMA against the FMAs.
        return pl.pallas_call(
            linear_kernel,
            out_shape=jax.ShapeDtypeStruct((B, 1), x.dtype),
            grid_spec=pltpu.PrefetchScalarGridSpec(
                num_scalar_prefetch=1,          # wb lands in SMEM before the grid
                grid=(B // tile_b,),
                in_specs=[pl.BlockSpec((tile_b, D), lambda i, wb_ref: (i, 0))],
                out_specs=pl.BlockSpec((tile_b, 1), lambda i, wb_ref: (i, 0)),
            ),
            compiler_params=pltpu.CompilerParams(
                dimension_semantics=("parallel",)),
        )(wb, x)

    # Small-batch path (the module's B=64, D=2): the whole problem is <1 KiB,
    # one VMEM block, no grid scaffolding.
    return pl.pallas_call(
        linear_kernel,
        out_shape=jax.ShapeDtypeStruct((B, 1), x.dtype),
        in_specs=[
            pl.BlockSpec(memory_space=pltpu.MemorySpace.SMEM),  # packed w|b
            pl.BlockSpec(memory_space=pltpu.MemorySpace.VMEM),  # x (full block)
        ],
        out_specs=pl.BlockSpec(memory_space=pltpu.MemorySpace.VMEM),
    )(wb, x)


if __name__ == "__main__":
    input_dims = 2
    batch = 64

    key = jax.random.PRNGKey(0)
    kx, kw, kb, kx2 = jax.random.split(key, 4)

    # Input matches the script: torch.rand((64, 2)) -> uniform [0, 1)
    x = jax.random.uniform(kx, (batch, input_dims), dtype=jnp.float32)

    # Deterministic parameter init mimicking nn.Linear default:
    # uniform(-1/sqrt(in_features), 1/sqrt(in_features))
    bound = 1.0 / float(input_dims ** 0.5)
    w = jax.random.uniform(kw, (input_dims,), dtype=jnp.float32,
                           minval=-bound, maxval=bound)
    b = jax.random.uniform(kb, (1,), dtype=jnp.float32,
                           minval=-bound, maxval=bound)
    # Pack once at init time (not per call): single SMEM operand for the kernel.
    wb = jnp.concatenate([w, b]).astype(jnp.float32)

    # --- small-batch path (the module's actual shape) ---
    y = linear_forward(x, wb)
    jax.block_until_ready(y)
    y_ref = x @ w.reshape(input_dims, 1) + b.reshape(1, 1)
    assert y.shape == (batch, 1)
    assert jnp.allclose(y, y_ref, atol=1e-5), "mismatch vs reference (small B)"

    # --- exercise the gridded / "parallel" large-batch path once ---
    big_b = 1024
    x_big = jax.random.uniform(kx2, (big_b, input_dims), dtype=jnp.float32)
    y_big = linear_forward(x_big, wb, tile_b=512)
    jax.block_until_ready(y_big)
    y_big_ref = x_big @ w.reshape(input_dims, 1) + b.reshape(1, 1)
    assert y_big.shape == (big_b, 1)
    assert jnp.allclose(y_big, y_big_ref, atol=1e-5), "mismatch vs reference (big B)"

    print("KERNEL_OK")
</pallas_src>

<mosaic_0001>
module attributes {stable_mosaic.version = 11 : i64} {
  func.func @linear_kernel(%arg0: memref<3xf32, #tpu.memory_space<smem>>, %arg1: memref<64x2xf32, #tpu.memory_space<vmem>>, %arg2: memref<64x1xf32, #tpu.memory_space<vmem>>) attributes {dimension_semantics = [], scalar_prefetch = 0 : i64, scratch_operands = 0 : i64, tpu.core_type = #tpu.core_type<tc>} {
    %c0 = arith.constant 0 : index
    %c0_0 = arith.constant 0 : index
    %0 = vector.load %arg1[%c0, %c0_0] : memref<64x2xf32, #tpu.memory_space<vmem>>, vector<64x1xf32>
    %c0_1 = arith.constant 0 : index
    %1 = memref.load %arg0[%c0_1] : memref<3xf32, #tpu.memory_space<smem>>
    %2 = vector.broadcast %1 : f32 to vector<64x1xf32>
    %3 = arith.mulf %0, %2 : vector<64x1xf32>
    %c0_2 = arith.constant 0 : index
    %c1 = arith.constant 1 : index
    %4 = vector.load %arg1[%c0_2, %c1] : memref<64x2xf32, #tpu.memory_space<vmem>>, vector<64x1xf32>
    %c1_3 = arith.constant 1 : index
    %5 = memref.load %arg0[%c1_3] : memref<3xf32, #tpu.memory_space<smem>>
    %6 = vector.broadcast %5 : f32 to vector<64x1xf32>
    %7 = arith.mulf %4, %6 : vector<64x1xf32>
    %8 = arith.addf %3, %7 : vector<64x1xf32>
    %c2 = arith.constant 2 : index
    %9 = memref.load %arg0[%c2] : memref<3xf32, #tpu.memory_space<smem>>
    %10 = vector.broadcast %9 : f32 to vector<64x1xf32>
    %11 = arith.addf %8, %10 : vector<64x1xf32>
    %c0_4 = arith.constant 0 : index
    %c0_5 = arith.constant 0 : index
    %12 = vector.load %arg2[%c0_4, %c0_5] : memref<64x1xf32, #tpu.memory_space<vmem>>, vector<64x1xf32>
    tpu.vector_store %arg2[%c0_4, %c0_5], %11 {strides = array<i32>} : memref<64x1xf32, #tpu.memory_space<vmem>>, vector<64x1xf32>,
    return
  }
}

</mosaic_0001>

<bundles_post_ra>
// kernel: tpu_custom_call.1
= control target key start
LH: loop header
LB: loop body
LE: loop exit
PB: predicated region body
PF: predicated region fallthrough
CT: control target
= control target key end

     0   :  { %7 = vsyncpa [#allocation3], 0  ;;  %s210_s0 = inlined_call_operand.vmem [shape: f32[3], index: 0, kind: input, shape index: {}]   ;;  %s211_s1 = inlined_call_operand.vmem [shape: f32[64,2], index: 1, kind: input, shape index: {}]   ;;  %s212_s2 = inlined_call_operand.vmem [shape: f32[64,1], index: 2, kind: output, shape index: {}]  }
   0x1   :  { %s14_s11 = sshll.u32 %s210_s0, 4  ;;  %s15_s11 = int_to_ptr.vmem [resolvable:$true] %s14_s11 }
   0x2   :  { %s120_s12 = scalar_lea.vmem %s15_s11, 16  ;;  %p125_p1 = scmp.lt.s32.totalorder %s15_s11, %s15_s11 }
   0x3   :  { %p121_p0 = scmp.ne.s32.totalorder %s15_s11, %s120_s12  ;;  %p126_p2 = scmp.lt.s32.totalorder %s120_s12, %s120_s12 }
   0x5   :  { %p127_p3 = por %p126_p2, %p125_p1 }
   0x7   :  { %p128_p4 = pnand %p127_p3, %p121_p0 }
   0x9   :  { %131 = shalt.err (!%p128_p4)
}
   0xa   :  { %s134_s13 = smov [#allocation2]  }
   0xb   :  { %17 = dma.vmem_to_smem %s15_s11, 16, %s134_s13, [#allocation3]  }
   0xc   :  { %132 = dma.done.wait [#allocation3], 16  }
   0xd   :  { %133 = vsyncadd [#allocation3], 4294967280 }
   0xe   :  { %23 = sfence }
   0xf   :  { %s116_s14 = sld [smem:[#allocation2 + $0x1]]  ;;  %v26_v0 = vld [vmem:[%s211_s1 + $0x10] sm:$0xff]  ;;  %v24_v1 = vld [vmem:[%s211_s1] sm:$0xff]  ;;  %v27_v3 = vld [vmem:[%s211_s1 + $0x18] sm:$0xff]  ;;  %s135_s22 = smov 127   ;;  %vm102_vm0 = vcmask 7168  }
  0x10   :  { %v25_v4 = vld [vmem:[%s211_s1 + $0x8] sm:$0xff]  ;;  %v28_v10 = vld [vmem:[%s211_s1 + $0x20] sm:$0xff]  ;;  %v31_v13 = vld [vmem:[%s211_s1 + $0x38] sm:$0xff]  ;;  %s32_s3 = sld [smem:[#allocation2]]  ;;  %s117_s4 = sld [smem:[#allocation2 + $0x2]] }
  0x11   :  { %v29_v9 = vld [vmem:[%s211_s1 + $0x28] sm:$0xff]  ;;  %v30_v14 = vld [vmem:[%s211_s1 + $0x30] sm:$0xff] }
  0x15   :  { %v43_v2 = vstv %s116_s14 }
  0x16   :  { %v46_v5 = vmul.f32 %v43_v2, %v26_v0  ;;  %v44_v6 = vmul.f32 %v43_v2, %v24_v1  ;;  %v47_v7 = vmul.f32 %v43_v2, %v27_v3  ;;  %v45_v8 = vmul.f32 %v43_v2, %v25_v4 }
  0x17   :  { %v49_v11 = vmul.f32 %v43_v2, %v29_v9  ;;  %v48_v12 = vmul.f32 %v43_v2, %v28_v10  ;;  %v51_v15 = vmul.f32 %v43_v2, %v31_v13  ;;  %v50_v16 = vmul.f32 %v43_v2, %v30_v14 }
  0x18   :  { %64 = vrot.lane.b32.xlu1 %v46_v5, %s135_s22  ;;  %60 = vrot.lane.b32.xlu0 %v44_v6, %s135_s22  ;;  %v33_v17 = vstv %s32_s3  ;;  %v93_v20 = vstv %s117_s4 }
  0x19   :  { %v36_v18 = vmul.f32 %v33_v17, %v26_v0  ;;  %v34_v19 = vmul.f32 %v33_v17, %v24_v1  ;;  %v37_v25 = vmul.f32 %v33_v17, %v27_v3  ;;  %v35_v26 = vmul.f32 %v33_v17, %v25_v4 }
  0x1a   :  { %v39_v33 = vmul.f32 %v33_v17, %v29_v9  ;;  %v38_v34 = vmul.f32 %v33_v17, %v28_v10  ;;  %v41_v41 = vmul.f32 %v33_v17, %v31_v13  ;;  %v40_v42 = vmul.f32 %v33_v17, %v30_v14 }
  0x1c   :  { %66 = vrot.lane.b32.xlu1 %v47_v7, %s135_s22  ;;  %62 = vrot.lane.b32.xlu0 %v45_v8, %s135_s22 }
  0x20   :  { %70 = vrot.lane.b32.xlu1 %v49_v11, %s135_s22  ;;  %68 = vrot.lane.b32.xlu0 %v48_v12, %s135_s22 }
  0x24   :  { %74 = vrot.lane.b32.xlu1 %v51_v15, %s135_s22  ;;  %72 = vrot.lane.b32.xlu0 %v50_v16, %s135_s22 }
  0x8a   :  { %v65_v21 = vpop.permute.xlu1 %64  ;;  %v61_v22 = vpop.permute.xlu0 %60 }
  0x8b   :  { %v86_v23 = vadd.f32 %v65_v21, %v36_v18  ;;  %v84_v24 = vadd.f32 %v61_v22, %v34_v19 }
  0x8d   :  { %v96_v27 = vadd.f32 %v93_v20, %v86_v23  ;;  %v94_v28 = vadd.f32 %v93_v20, %v84_v24 }
  0x8e   :  { %v67_v29 = vpop.permute.xlu1 %66  ;;  %v63_v30 = vpop.permute.xlu0 %62 }
  0x8f   :  { %105 = vst.msk [vmem:[%s212_s2 + $0x10] sm:$0xff] %vm102_vm0, %v96_v27  ;;  %103 = vst.msk [vmem:[%s212_s2] sm:$0xff] %vm102_vm0, %v94_v28  ;;  %v87_v31 = vadd.f32 %v67_v29, %v37_v25  ;;  %v85_v32 = vadd.f32 %v63_v30, %v35_v26 }
  0x91   :  { %v97_v35 = vadd.f32 %v93_v20, %v87_v31  ;;  %v95_v36 = vadd.f32 %v93_v20, %v85_v32 }
  0x92   :  { %v71_v37 = vpop.permute.xlu1 %70  ;;  %v69_v38 = vpop.permute.xlu0 %68 }
  0x93   :  { %106 = vst.msk [vmem:[%s212_s2 + $0x18] sm:$0xff] %vm102_vm0, %v97_v35  ;;  %104 = vst.msk [vmem:[%s212_s2 + $0x8] sm:$0xff] %vm102_vm0, %v95_v36  ;;  %v89_v39 = vadd.f32 %v71_v37, %v39_v33  ;;  %v88_v40 = vadd.f32 %v69_v38, %v38_v34 }
  0x95   :  { %v99_v43 = vadd.f32 %v93_v20, %v89_v39  ;;  %v98_v44 = vadd.f32 %v93_v20, %v88_v40 }
  0x96   :  { %v75_v45 = vpop.permute.xlu1 %74  ;;  %v73_v46 = vpop.permute.xlu0 %72 }
  0x97   :  { %108 = vst.msk [vmem:[%s212_s2 + $0x28] sm:$0xff] %vm102_vm0, %v99_v43  ;;  %107 = vst.msk [vmem:[%s212_s2 + $0x20] sm:$0xff] %vm102_vm0, %v98_v44  ;;  %v91_v47 = vadd.f32 %v75_v45, %v41_v41  ;;  %v90_v48 = vadd.f32 %v73_v46, %v40_v42 }
  0x99   :  { %v101_v49 = vadd.f32 %v93_v20, %v91_v47  ;;  %v100_v50 = vadd.f32 %v93_v20, %v90_v48 }
  0x9b   :  { %110 = vst.msk [vmem:[%s212_s2 + $0x38] sm:$0xff] %vm102_vm0, %v101_v49  ;;  %109 = vst.msk [vmem:[%s212_s2 + $0x30] sm:$0xff] %vm102_vm0, %v100_v50 }
  0x9c   :  { %115 = vsyncpa [#allocation3], 1 }

</bundles_post_ra>
